<compile_context>
chip_gen: v5e
topology: v5e:2x2
jax: 0.10.0
libtpu: 0.0.40
codegen_flags: <defaults>
</compile_context>

<pallas_src>
import functools

import jax
import jax.numpy as jnp
from jax.experimental import pallas as pl
from jax.experimental.pallas import tpu as pltpu


# ----------------------------- helpers ---------------------------------------
def _round_up(x, m):
    return ((x + m - 1) // m) * m


def _apply_activation(y, activation):
    # Matches BPNetwork.nonlinearity; leakyrelu slope is 0.2 per the reference
    # module (F.leaky_relu(x, 0.2)).
    if activation == "relu":
        return jnp.maximum(y, 0.0)
    if activation == "tanh":
        return jnp.tanh(y)
    if activation == "leakyrelu":
        return jnp.where(y >= 0.0, y, 0.2 * y)
    if activation == "sigmoid":
        return jax.nn.sigmoid(y)
    if activation == "linear":
        return y
    raise ValueError(f"unsupported activation {activation!r}")


def _choose_batch_tile(B, batch_tile):
    """Batch lives on the lane (last) axis, so a tile must be a multiple of 128
    or the full (untiled) batch dimension."""
    if B <= 128:
        return B  # single full-dim block; grid=(1,) -- latency-bound regime anyway
    tb = min(_round_up(batch_tile, 128), _round_up(B, 128))
    # v7x has 2 TensorCores: make sure the "parallel" batch axis yields >= 2 tiles
    # so the second core is not idle for moderate batch sizes.
    if pl.cdiv(B, tb) < 2:
        tb = _round_up(pl.cdiv(B, 2), 128)
    return tb


# ----------------------------- fused Pallas kernel ---------------------------
def _make_fused_mlp_kernel(num_layers, activation, output_activation):
    """Fused MLP over one batch tile, transposed layout:

        h_T = x_T                              # (Fin, TB)   -- batch on lanes
        h_T = act_i(W_i @ h_T + b_i)           # W_i: (fo, fi), b_i: (fo, 1)

    refs layout: (xT_ref, w0_ref, b0_ref, w1_ref, b1_ref, ..., oT_ref).
    All intermediates live in f32 vregs/VMEM -- nothing is written back to HBM
    except the final (Fout, TB) output tile.
    """

    def kernel(*refs):
        xT_ref = refs[0]
        oT_ref = refs[-1]
        wb_refs = refs[1:-1]

        h = xT_ref[...]  # (Fin, TB)
        for i in range(num_layers):
            w = wb_refs[2 * i][...]      # (fo, fi) -- PyTorch [out, in] layout
            b = wb_refs[2 * i + 1][...]  # (fo, 1)  -- broadcasts over lanes (batch)
            # MXU matmul with f32 accumulation; output columns = batch = lane-dense.
            h = jnp.dot(w, h, preferred_element_type=jnp.float32) + b
            act = activation if i < num_layers - 1 else output_activation
            h = _apply_activation(h, act)

        oT_ref[...] = h.astype(oT_ref.dtype)

    return kernel


def bpnetwork_forward(params, x, activation="relu", output_activation="linear",
                      batch_tile=1024):
    """Single fused pallas_call implementing BPNetwork.forward.

    params: list of (W[out, in], b[out, 1]) arrays (PyTorch weight layout).
    x:      [B, n_in]
    Returns [B, n_out].
    """
    B, Fin = x.shape
    num_layers = len(params)
    Fout = params[-1][0].shape[0]

    # Layout plumbing: present x as (Fin, B) so batch lands on the 128-lane axis.
    xT = x.T

    TB = _choose_batch_tile(B, batch_tile)
    grid = (pl.cdiv(B, TB),)

    in_specs = [pl.BlockSpec((Fin, TB), lambda i: (0, i))]
    args = [xT]
    for (w, b) in params:
        fo, fi = w.shape
        # Constant index_map -> weights/biases stay resident in VMEM across batch
        # tiles (single DMA). No double-buffering needed; default pipeline_mode is
        # kept since the redundant buffer is only a few KiB at these feature sizes.
        in_specs.append(pl.BlockSpec((fo, fi), lambda i: (0, 0)))
        in_specs.append(pl.BlockSpec((fo, 1), lambda i: (0, 0)))
        args.append(w)
        args.append(b)

    kernel = _make_fused_mlp_kernel(num_layers, activation, output_activation)
    outT = pl.pallas_call(
        kernel,
        out_shape=jax.ShapeDtypeStruct((Fout, B), x.dtype),
        grid=grid,
        in_specs=in_specs,
        # Lane-dense output block: (Fout, TB) with TB a multiple of 128 (or full B)
        # -> unmasked vector stores for large batches.
        out_specs=pl.BlockSpec((Fout, TB), lambda i: (0, i)),
        # "parallel" batch axis: on v7x the two TensorCores split batch tiles;
        # neutral (single TC) on v5e/v6e.
        compiler_params=pltpu.CompilerParams(dimension_semantics=("parallel",)),
    )(*args)
    return outT.T


# --------------------------- Parameter construction --------------------------
def orthogonal_init(key, fan_in, fan_out, gain):
    """Orthogonal init matching nn.init.orthogonal_ semantics for a PyTorch
    [out, in] weight (rows orthonormal when out <= in). Returns [out, in]."""
    rows, cols = fan_out, fan_in
    flat = jax.random.normal(key, (max(rows, cols), min(rows, cols)), jnp.float32)
    q, r = jnp.linalg.qr(flat)
    d = jnp.sign(jnp.diag(r))
    d = jnp.where(d == 0, 1.0, d)  # avoid zeroing columns when diag(R) == 0
    q = q * d[None, :]
    if rows < cols:
        q = q.T
    return gain * q[:rows, :cols]  # [out, in] (PyTorch layout)


def build_bpnetwork_params(key, n_in, n_hidden, n_out):
    """Replicates BPNetwork.__init__ with initialization='orthogonal', bias=True.
    Gain = sqrt(6 / (fan_in + fan_out)), biases zero, weights kept in [out, in]."""
    n_all = [n_in] + (n_hidden if n_hidden is not None else []) + [n_out]
    params = []
    for i in range(1, len(n_all)):
        key, sub = jax.random.split(key)
        fan_in, fan_out = n_all[i - 1], n_all[i]
        gain = float(jnp.sqrt(6.0 / (fan_in + fan_out)))
        w = orthogonal_init(sub, fan_in, fan_out, gain)   # [out, in]
        b = jnp.zeros((fan_out, 1), jnp.float32)          # zero bias, lane-broadcast shape
        params.append((w, b))
    return params


# ----------------------------------- main ------------------------------------
if __name__ == "__main__":
    key = jax.random.PRNGKey(0)
    k_param, k_x1, k_x2 = jax.random.split(key, 3)

    # Shapes consistent with the MLP forward: n_in=16, n_hidden=[32, 32], n_out=8.
    n_in, n_hidden, n_out = 16, [32, 32], 8
    params = build_bpnetwork_params(k_param, n_in, n_hidden, n_out)

    fwd = jax.jit(functools.partial(
        bpnetwork_forward, activation="relu", output_activation="linear"))

    def reference(params, x):
        h = x
        for w, b in params[:-1]:
            h = jnp.maximum(h @ w.T + b[:, 0], 0.0)
        w, b = params[-1]
        return h @ w.T + b[:, 0]

    # Case 1: tiny batch (grid=(1,), latency-bound regime -- see notes above).
    x_small = jax.random.normal(k_x1, (8, n_in), jnp.float32)
    out_small = jax.block_until_ready(fwd(params, x_small))
    assert out_small.shape == (8, n_out)
    assert jnp.allclose(out_small, reference(params, x_small), atol=1e-4, rtol=1e-5)

    # Case 2: batch large enough to exercise the lane-dense tiled path
    # (TB=128, grid=(2,) -> both TensorCores busy on v7x).
    x_big = jax.random.normal(k_x2, (256, n_in), jnp.float32)
    out_big = jax.block_until_ready(fwd(params, x_big))
    assert out_big.shape == (256, n_out)
    assert jnp.allclose(out_big, reference(params, x_big), atol=1e-4, rtol=1e-5)

    # TODO(synk): save_logs / set_requires_grad are training-side utilities with no
    # forward-pass (kernel) equivalent; intentionally not translated.
    print("KERNEL_OK")
</pallas_src>

<mosaic_0001>
module attributes {stable_mosaic.version = 11 : i64} {
  func.func @kernel(%arg0: i32, %arg1: memref<16x8xf32, #tpu.memory_space<vmem>>, %arg2: memref<32x16xf32, #tpu.memory_space<vmem>>, %arg3: memref<32x1xf32, #tpu.memory_space<vmem>>, %arg4: memref<32x32xf32, #tpu.memory_space<vmem>>, %arg5: memref<32x1xf32, #tpu.memory_space<vmem>>, %arg6: memref<8x32xf32, #tpu.memory_space<vmem>>, %arg7: memref<8x1xf32, #tpu.memory_space<vmem>>, %arg8: memref<8x8xf32, #tpu.memory_space<vmem>>) attributes {dimension_semantics = [#tpu.dimension_semantics<parallel>], iteration_bounds = array<i64: 1>, scalar_prefetch = 0 : i64, scratch_operands = 0 : i64, tpu.core_type = #tpu.core_type<tc>, window_params = [{transform_indices = @transform_0, window_bounds = array<i64: 16, 8>}, {pipeline_mode = #tpu.pipeline_mode<synchronous>, transform_indices = @transform_1, window_bounds = array<i64: 32, 16>}, {pipeline_mode = #tpu.pipeline_mode<synchronous>, transform_indices = @transform_2, window_bounds = array<i64: 32, 1>}, {pipeline_mode = #tpu.pipeline_mode<synchronous>, transform_indices = @transform_3, window_bounds = array<i64: 32, 32>}, {pipeline_mode = #tpu.pipeline_mode<synchronous>, transform_indices = @transform_4, window_bounds = array<i64: 32, 1>}, {pipeline_mode = #tpu.pipeline_mode<synchronous>, transform_indices = @transform_5, window_bounds = array<i64: 8, 32>}, {pipeline_mode = #tpu.pipeline_mode<synchronous>, transform_indices = @transform_6, window_bounds = array<i64: 8, 1>}, {transform_indices = @transform_7, window_bounds = array<i64: 8, 8>}]} {
    %c0 = arith.constant 0 : index
    %c0_0 = arith.constant 0 : index
    %0 = vector.load %arg1[%c0, %c0_0] : memref<16x8xf32, #tpu.memory_space<vmem>>, vector<16x8xf32>
    %c0_1 = arith.constant 0 : index
    %c0_2 = arith.constant 0 : index
    %1 = vector.load %arg2[%c0_1, %c0_2] : memref<32x16xf32, #tpu.memory_space<vmem>>, vector<32x16xf32>
    %c0_3 = arith.constant 0 : index
    %c0_4 = arith.constant 0 : index
    %2 = vector.load %arg3[%c0_3, %c0_4] : memref<32x1xf32, #tpu.memory_space<vmem>>, vector<32x1xf32>
    %cst = arith.constant dense<0.000000e+00> : vector<32x8xf32>
    %3 = tpu.matmul %1, %0, %cst {dimension_numbers = #tpu.dot_dimension_numbers<[1], [0], [0], [1], [0, 0, 1, 1], [], []>} : vector<32x16xf32>, vector<16x8xf32>, vector<32x8xf32> -> vector<32x8xf32>
    %4 = vector.broadcast %2 : vector<32x1xf32> to vector<32x8xf32>
    %5 = arith.addf %3, %4 : vector<32x8xf32>
    %cst_5 = arith.constant 0.000000e+00 : f32
    %6 = vector.broadcast %cst_5 : f32 to vector<32x8xf32>
    %7 = arith.maximumf %5, %6 : vector<32x8xf32>
    %c0_6 = arith.constant 0 : index
    %c0_7 = arith.constant 0 : index
    %8 = vector.load %arg4[%c0_6, %c0_7] : memref<32x32xf32, #tpu.memory_space<vmem>>, vector<32x32xf32>
    %c0_8 = arith.constant 0 : index
    %c0_9 = arith.constant 0 : index
    %9 = vector.load %arg5[%c0_8, %c0_9] : memref<32x1xf32, #tpu.memory_space<vmem>>, vector<32x1xf32>
    %cst_10 = arith.constant dense<0.000000e+00> : vector<32x8xf32>
    %10 = tpu.matmul %8, %7, %cst_10 {dimension_numbers = #tpu.dot_dimension_numbers<[1], [0], [0], [1], [0, 0, 1, 1], [], []>} : vector<32x32xf32>, vector<32x8xf32>, vector<32x8xf32> -> vector<32x8xf32>
    %11 = vector.broadcast %9 : vector<32x1xf32> to vector<32x8xf32>
    %12 = arith.addf %10, %11 : vector<32x8xf32>
    %cst_11 = arith.constant 0.000000e+00 : f32
    %13 = vector.broadcast %cst_11 : f32 to vector<32x8xf32>
    %14 = arith.maximumf %12, %13 : vector<32x8xf32>
    %c0_12 = arith.constant 0 : index
    %c0_13 = arith.constant 0 : index
    %15 = vector.load %arg6[%c0_12, %c0_13] : memref<8x32xf32, #tpu.memory_space<vmem>>, vector<8x32xf32>
    %c0_14 = arith.constant 0 : index
    %c0_15 = arith.constant 0 : index
    %16 = vector.load %arg7[%c0_14, %c0_15] : memref<8x1xf32, #tpu.memory_space<vmem>>, vector<8x1xf32>
    %cst_16 = arith.constant dense<0.000000e+00> : vector<8x8xf32>
    %17 = tpu.matmul %15, %14, %cst_16 {dimension_numbers = #tpu.dot_dimension_numbers<[1], [0], [0], [1], [0, 0, 1, 1], [], []>} : vector<8x32xf32>, vector<32x8xf32>, vector<8x8xf32> -> vector<8x8xf32>
    %18 = vector.broadcast %16 : vector<8x1xf32> to vector<8x8xf32>
    %19 = arith.addf %17, %18 : vector<8x8xf32>
    %c0_17 = arith.constant 0 : index
    %c0_18 = arith.constant 0 : index
    %20 = vector.load %arg8[%c0_17, %c0_18] : memref<8x8xf32, #tpu.memory_space<vmem>>, vector<8x8xf32>
    tpu.vector_store %arg8[%c0_17, %c0_18], %19 {strides = array<i32>} : memref<8x8xf32, #tpu.memory_space<vmem>>, vector<8x8xf32>,
    return
  }
  func.func @transform_0(%arg0: i32) -> (i32, i32) {
    %c0_i32 = arith.constant 0 : i32
    %c0_i32_0 = arith.constant 0 : i32
    return %c0_i32, %arg0 : i32, i32
  }
  func.func @transform_1(%arg0: i32) -> (i32, i32) {
    %c0_i32 = arith.constant 0 : i32
    %c0_i32_0 = arith.constant 0 : i32
    %c0_i32_1 = arith.constant 0 : i32
    return %c0_i32, %c0_i32_0 : i32, i32
  }
  func.func @transform_2(%arg0: i32) -> (i32, i32) {
    %c0_i32 = arith.constant 0 : i32
    %c0_i32_0 = arith.constant 0 : i32
    %c0_i32_1 = arith.constant 0 : i32
    return %c0_i32, %c0_i32_0 : i32, i32
  }
  func.func @transform_3(%arg0: i32) -> (i32, i32) {
    %c0_i32 = arith.constant 0 : i32
    %c0_i32_0 = arith.constant 0 : i32
    %c0_i32_1 = arith.constant 0 : i32
    return %c0_i32, %c0_i32_0 : i32, i32
  }
  func.func @transform_4(%arg0: i32) -> (i32, i32) {
    %c0_i32 = arith.constant 0 : i32
    %c0_i32_0 = arith.constant 0 : i32
    %c0_i32_1 = arith.constant 0 : i32
    return %c0_i32, %c0_i32_0 : i32, i32
  }
  func.func @transform_5(%arg0: i32) -> (i32, i32) {
    %c0_i32 = arith.constant 0 : i32
    %c0_i32_0 = arith.constant 0 : i32
    %c0_i32_1 = arith.constant 0 : i32
    return %c0_i32, %c0_i32_0 : i32, i32
  }
  func.func @transform_6(%arg0: i32) -> (i32, i32) {
    %c0_i32 = arith.constant 0 : i32
    %c0_i32_0 = arith.constant 0 : i32
    %c0_i32_1 = arith.constant 0 : i32
    return %c0_i32, %c0_i32_0 : i32, i32
  }
  func.func @transform_7(%arg0: i32) -> (i32, i32) {
    %c0_i32 = arith.constant 0 : i32
    %c0_i32_0 = arith.constant 0 : i32
    return %c0_i32, %arg0 : i32, i32
  }
}

</mosaic_0001>

<bundles_post_ra>
// kernel: bpnetwork_forward.1
= control target key start
LH: loop header
LB: loop body
LE: loop exit
PB: predicated region body
PF: predicated region fallthrough
CT: control target
= control target key end

     0   :  { %v235_v2 = vmov 0   ;;  %vm56_vm0 = vcmask 130048   ;;  %vm130_vm1 = vcmask 261120   ;;  %vm206_vm2 = vcmask 64512   ;;  %s348_s0 = inlined_call_operand.vmem [shape: f32[16,8], index: 0, kind: input, shape index: {}]   ;;  %s349_s1 = inlined_call_operand.vmem [shape: f32[32,16], index: 1, kind: input, shape index: {}]   ;;  %s350_s2 = inlined_call_operand.vmem [shape: f32[32,1], index: 2, kind: input, shape index: {}]   ;;  %s351_s4 = inlined_call_operand.vmem [shape: f32[32,1], index: 4, kind: input, shape index: {}]   ;;  %s352_s6 = inlined_call_operand.vmem [shape: f32[8,1], index: 6, kind: input, shape index: {}]   ;;  %s353_s3 = inlined_call_operand.vmem [shape: f32[32,32], index: 3, kind: input, shape index: {}]   ;;  %s354_s5 = inlined_call_operand.vmem [shape: f32[8,32], index: 5, kind: input, shape index: {}]   ;;  %s355_s7 = inlined_call_operand.vmem [shape: f32[8,8], index: 7, kind: output, shape index: {}]  }
   0x1   :  { %v27_v0 = vld [vmem:[%s348_s0 + $0x8] sm:$0xff]  ;;  %v26_v1 = vld [vmem:[%s348_s0] sm:$0xff]  ;;  %233 = vset.pattern.permute.xlu1 %v235_v2  ;;  %232 = vset.pattern.permute.xlu0 %v235_v2  ;;  %v35_v4 = vld [vmem:[%s350_s2 + $0x18] sm:$0xff] }
   0x2   :  { %83 = vmatpush.msra.mxu0 %v27_v0  ;;  %v28_v3 = vld [vmem:[%s349_s1] sm:$0xff]  ;;  %v33_v5 = vld [vmem:[%s350_s2 + $0x8] sm:$0xff]  ;;  %221 = vmatpush.msra.mxu1 %v27_v0  ;;  %v31_v6 = vld [vmem:[%s349_s1 + $0x18] sm:$0xff] }
   0x3   :  { %53 = vperm.xlu0 %232, %v35_v4   ;;  %43 = vperm.xlu1 %233, %v33_v5   ;;  %v34_v7 = vld [vmem:[%s350_s2 + $0x10] sm:$0xff]  ;;  %v32_v8 = vld [vmem:[%s350_s2] sm:$0xff]  ;;  %v29_v9 = vld [vmem:[%s349_s1 + $0x8] sm:$0xff] }
   0x4   :  { %84 = vmatpush.msra.mxu0 %v26_v1  ;;  %222 = vmatpush.msra.mxu1 %v26_v1  ;;  %v107_v10 = vld [vmem:[%s351_s4 + $0x8] sm:$0xff]  ;;  %v106_v11 = vld [vmem:[%s351_s4] sm:$0xff]  ;;  %v30_v12 = vld [vmem:[%s349_s1 + $0x10] sm:$0xff] }
   0x5   :  { %212 = vmatmul.msk.f32.vlgmr.msra.gmra.mxu0 %vm56_vm0, %v28_v3  ;;  %215 = vmatmul.msk.f32.vlgmr.msra.gmra.mxu1 %vm56_vm0, %v31_v6  ;;  %v109_v18 = vld [vmem:[%s351_s4 + $0x18] sm:$0xff]  ;;  %v108_v21 = vld [vmem:[%s351_s4 + $0x10] sm:$0xff]  ;;  %v177_v27 = vld [vmem:[%s352_s6] sm:$0xff] }
   0x6   :  { %234 = vset.pattern.permute.xlu2 %v235_v2  ;;  %v102_v32 = vld [vmem:[%s353_s3] sm:$0xff]  ;;  %v103_v33 = vld [vmem:[%s353_s3 + $0x8] sm:$0xff]  ;;  %v104_v34 = vld [vmem:[%s353_s3 + $0x10] sm:$0xff] }
   0x7   :  { %127 = vperm.xlu2 %234, %v109_v18   ;;  %v105_v35 = vld [vmem:[%s353_s3 + $0x18] sm:$0xff]  ;;  %v176_v52 = vld [vmem:[%s354_s5] sm:$0xff] }
   0xb   :  { %48 = vperm.xlu0 %232, %v34_v7   ;;  %38 = vperm.xlu1 %233, %v32_v8  }
   0xd   :  { %213 = vmatmul.msk.f32.gmra.mxu0 %vm56_vm0, %v29_v9 }
   0xf   :  { %122 = vperm.xlu2 %234, %v108_v21  }
  0x13   :  { %117 = vperm.xlu0 %232, %v107_v10   ;;  %112 = vperm.xlu1 %233, %v106_v11  }
  0x15   :  { %214 = vmatmul.msk.f32.gmra.mxu0 %vm56_vm0, %v30_v12 }
  0x17   :  { %180 = vperm.xlu2 %234, %v177_v27  }
  0x61   :  { %v128_v36 = vpop.permute.xlu2 %127 }
  0x69   :  { %v123_v38 = vpop.permute.xlu2 %122 }
  0x71   :  { %v181_v53 = vpop.permute.xlu2 %180 }
  0x75   :  { %v54_v13 = vpop.permute.xlu0 %53  ;;  %v44_v19 = vpop.permute.xlu1 %43 }
  0x7d   :  { %v49_v22 = vpop.permute.xlu0 %48  ;;  %v39_v23 = vpop.permute.xlu1 %38 }
  0x82   :  { %v86_v14 = vpop.f32.mrf.mxu0  ;;  %v95_v15 = vpop.f32.mrf.mxu1 }
  0x83   :  { %v96_v16 = vadd.f32 %v95_v15, %v54_v13  ;;  %v87_v28 = vadd.f32 %v86_v14, %v39_v23 }
  0x85   :  { %v101_v17 = vmax.f32 %v96_v16, 0.0  ;;  %v98_v31 = vmax.f32 %v87_v28, 0.0  ;;  %v118_v43 = vpop.permute.xlu0 %117  ;;  %v113_v47 = vpop.permute.xlu1 %112 }
  0x87   :  { %155 = vmatpush.msrb.mxu1 %v101_v17  ;;  %223 = vmatpush.msra.mxu2 %v101_v17 }
  0x88   :  { %224 = vmatpush.msra.mxu3 %v101_v17 }
  0x8a   :  { %v89_v20 = vpop.f32.mrf.mxu0 }
  0x8b   :  { %v90_v25 = vadd.f32 %v89_v20, %v44_v19 }
  0x8d   :  { %v99_v30 = vmax.f32 %v90_v25, 0.0 }
  0x92   :  { %v92_v24 = vpop.f32.mrf.mxu0 }
  0x93   :  { %v93_v26 = vadd.f32 %v92_v24, %v49_v22 }
  0x95   :  { %v100_v29 = vmax.f32 %v93_v26, 0.0 }
  0x97   :  { %156 = vmatpush.msrb.mxu1 %v100_v29  ;;  %225 = vmatpush.msra.mxu2 %v100_v29 }
  0x98   :  { %226 = vmatpush.msra.mxu3 %v100_v29 }
  0x99   :  { %157 = vmatpush.msrb.mxu1 %v99_v30  ;;  %227 = vmatpush.msra.mxu2 %v99_v30 }
  0x9a   :  { %228 = vmatpush.msra.mxu3 %v99_v30 }
  0x9b   :  { %158 = vmatpush.msrb.mxu1 %v98_v31  ;;  %229 = vmatpush.msra.mxu2 %v98_v31 }
  0x9c   :  { %230 = vmatpush.msra.mxu3 %v98_v31  ;;  %216 = vmatmul.msk.f32.vlgmr.msrb.gmra.mxu1 %vm130_vm1, %v102_v32 }
  0x9d   :  { %217 = vmatmul.msk.f32.vlgmr.msra.gmra.mxu2 %vm130_vm1, %v103_v33  ;;  %218 = vmatmul.msk.f32.vlgmr.msra.gmra.mxu3 %vm130_vm1, %v104_v34 }
  0xa5   :  { %219 = vmatmul.msk.f32.gmra.mxu3 %vm130_vm1, %v105_v35 }
 0x119   :  { %v160_v44 = vpop.f32.mrf.mxu1 }
 0x11a   :  { %v161_v48 = vadd.f32 %v160_v44, %v113_v47 }
 0x11c   :  { %v172_v51 = vmax.f32 %v161_v48, 0.0 }
 0x120   :  { %v166_v37 = vpop.f32.mrf.mxu3  ;;  %v163_v39 = vpop.f32.mrf.mxu2 }
 0x121   :  { %v167_v41 = vadd.f32 %v166_v37, %v123_v38  ;;  %v164_v45 = vadd.f32 %v163_v39, %v118_v43 }
 0x123   :  { %v174_v49 = vmax.f32 %v167_v41, 0.0  ;;  %v173_v50 = vmax.f32 %v164_v45, 0.0 }
 0x128   :  { %v169_v40 = vpop.f32.mrf.mxu3 }
 0x129   :  { %v170_v42 = vadd.f32 %v169_v40, %v128_v36 }
 0x12b   :  { %v175_v46 = vmax.f32 %v170_v42, 0.0 }
 0x12d   :  { %198 = vmatpush.msrb.mxu2 %v175_v46 }
 0x12f   :  { %199 = vmatpush.msrb.mxu2 %v174_v49 }
 0x131   :  { %200 = vmatpush.msrb.mxu2 %v173_v50 }
 0x133   :  { %201 = vmatpush.msrb.mxu2 %v172_v51 }
 0x134   :  { %220 = vmatmul.msk.f32.vlgmr.msrb.gmra.mxu2 %vm130_vm1, %v176_v52 }
 0x1b7   :  { %v203_v54 = vpop.f32.mrf.mxu2 }
 0x1b8   :  { %v204_v55 = vadd.f32 %v203_v54, %v181_v53 }
 0x1ba   :  { %207 = vst.msk [vmem:[%s355_s7] sm:$0xff] %vm206_vm2, %v204_v55 }

</bundles_post_ra>
